<compile_context>
chip_gen: v7x
topology: tpu7x:2x2x1
jax: 0.10.0
libtpu: 0.0.40
codegen_flags: <defaults>
</compile_context>

<pallas_src>
import functools

import jax
import jax.numpy as jnp
from jax.experimental import pallas as pl
from jax.experimental.pallas import tpu as pltpu


_LANE = 128
_SUBLANE = 8
# ~4 MiB of f32 per block.
_TARGET_BLOCK_ELEMS = (4 * 1024 * 1024) // 4
_MIN_GRID_STEPS = 4
_VMEM_LIMIT_BYTES = 40 << 20


def _normalize_kernel(row_tile, n_row_blocks, x_ref, scale_ref, bias_ref, o_ref):
    # x_ref / o_ref: (row_tile, lane_tile)
    # scale_ref / bias_ref: (R_pad, 1), fully VMEM-resident (constant
    # index_map -> DMA'd once for the whole grid); slice our row window.
    if n_row_blocks == 1:
        s = scale_ref[...]
        b = bias_ref[...]
    else:
        # n_row_blocks > 1 implies row_tile is a multiple of 8 (aligned slice).
        r0 = pl.multiple_of(pl.program_id(0) * row_tile, row_tile)
        s = scale_ref[pl.ds(r0, row_tile), :]
        b = bias_ref[pl.ds(r0, row_tile), :]
    # Single streaming FMA; scale/bias broadcast over the lane axis.
    o_ref[...] = (x_ref[...] * s + b).astype(o_ref.dtype)


def _choose_tiles(rows, lanes):
    """Fixed lane-dense tiles (multiples of (8,128)); edge blocks are masked."""
    # Lane tile: a multiple of 128 (full extent when lanes <= 128).
    if lanes <= _LANE:
        lane_tile = lanes
    else:
        cap = max(_LANE, (_TARGET_BLOCK_ELEMS // _SUBLANE) // _LANE * _LANE)
        lane_tile = min((lanes // _LANE) * _LANE, cap)
    # Row tile: a multiple of 8 (full extent when rows <= 8), block ~ target.
    if rows <= _SUBLANE:
        row_tile = rows
    else:
        cap = max(_SUBLANE, (_TARGET_BLOCK_ELEMS // lane_tile) // _SUBLANE * _SUBLANE)
        row_tile = min((rows // _SUBLANE) * _SUBLANE, cap)

    # Keep several grid steps so DMA/compute overlap and (on v7x) both
    # TensorCores get work; shrink the lane tile first, then the row tile.
    def steps(rt, lt):
        return pl.cdiv(rows, rt) * pl.cdiv(lanes, lt)

    while steps(row_tile, lane_tile) < _MIN_GRID_STEPS:
        if lane_tile >= 2 * _LANE:
            lane_tile = (lane_tile // 2) // _LANE * _LANE
        elif row_tile >= 2 * _SUBLANE:
            row_tile = (row_tile // 2) // _SUBLANE * _SUBLANE
        else:
            break
    return row_tile, lane_tile


@functools.partial(jax.jit, static_argnames=("assume_pixels",))
def _normalize_impl(x, mean, std, assume_pixels):
    N, C, H, W = x.shape
    R, L = N * C, H * W
    x2 = x.reshape(R, L)

    # Fold everything into per-channel scale/bias constants.
    inv_std = 1.0 / std.astype(jnp.float32)
    bias_c = -mean.astype(jnp.float32) * inv_std                   # (C,)
    if assume_pixels is None:
        # Exact torch semantics: global max over x (one extra HBM read;
        # jitted so it schedules back-to-back with the pallas_call).
        is_pixel = jnp.max(x) > 1.0
        scale_c = jnp.where(is_pixel, inv_std / 255.0, inv_std)    # (C,)
    elif assume_pixels:
        scale_c = inv_std / 255.0
    else:
        scale_c = inv_std

    row_tile, lane_tile = _choose_tiles(R, L)
    grid = (pl.cdiv(R, row_tile), pl.cdiv(L, lane_tile))
    r_pad = grid[0] * row_tile

    # Per-row (channel-repeated) scale/bias columns, padded to the row grid so
    # in-kernel slices of the edge block never read out of bounds.
    scale2 = jnp.broadcast_to(scale_c.reshape(1, C), (N, C)).reshape(R, 1)
    bias2 = jnp.broadcast_to(bias_c.reshape(1, C), (N, C)).reshape(R, 1)
    if r_pad != R:
        pad = ((0, r_pad - R), (0, 0))
        scale2 = jnp.pad(scale2, pad)
        bias2 = jnp.pad(bias2, pad)

    out2 = pl.pallas_call(
        functools.partial(_normalize_kernel, row_tile, grid[0]),
        out_shape=jax.ShapeDtypeStruct((R, L), x.dtype),
        grid=grid,
        in_specs=[
            pl.BlockSpec((row_tile, lane_tile), lambda i, j: (i, j)),
            pl.BlockSpec((r_pad, 1), lambda i, j: (0, 0)),   # VMEM-resident
            pl.BlockSpec((r_pad, 1), lambda i, j: (0, 0)),   # VMEM-resident
        ],
        out_specs=pl.BlockSpec((row_tile, lane_tile), lambda i, j: (i, j)),
        compiler_params=pltpu.CompilerParams(
            dimension_semantics=("parallel", "parallel"),
            vmem_limit_bytes=_VMEM_LIMIT_BYTES),
    )(x2, scale2, bias2)
    return out2.reshape(N, C, H, W)


def normalize(x, mean, std, assume_pixels=None):
    """Pallas port of `Normalize.forward`.

    assume_pixels: None  -> compute torch's `max(input) > 1` flag exactly
                            (adds one HBM read of x);
                   True  -> caller guarantees pixel-valued input (skip the max);
                   False -> caller guarantees already-normalized input.
    """
    return _normalize_impl(x, mean, std, assume_pixels=assume_pixels)


def _reference(x, mean, std):
    x = jnp.where(jnp.max(x) > 1.0, x / 255.0, x)
    return (x - mean.reshape(1, -1, 1, 1)) / std.reshape(1, -1, 1, 1)


if __name__ == "__main__":
    key = jax.random.PRNGKey(0)

    # Deterministic "buffers" (ImageNet-style constants).
    mean = jnp.array([0.485, 0.456, 0.406], dtype=jnp.float32)
    std = jnp.array([0.229, 0.224, 0.225], dtype=jnp.float32)

    shapes = [
        (2, 3, 16, 16),   # tiny: rows < 8, single row block
        (4, 3, 16, 16),   # rows = 12 (not a multiple of 8): masked edge row block
        (2, 3, 17, 19),   # lanes = 323 (not a multiple of 128): masked edge lane block
    ]

    for idx, shp in enumerate(shapes):
        k1, k2 = jax.random.split(jax.random.fold_in(key, idx))
        # Case 1: pixel-valued input in [0, 255] (triggers the /255 branch).
        x_pixels = jax.random.uniform(k1, shp, jnp.float32, 0.0, 255.0)
        # Case 2: already-normalized input in [0, 1] (no rescale).
        x_unit = jax.random.uniform(k2, shp, jnp.float32, 0.0, 1.0)

        for x in (x_pixels, x_unit):
            out = normalize(x, mean, std)              # exact torch semantics
            jax.block_until_ready(out)
            ref = _reference(x, mean, std)
            assert out.shape == ref.shape and out.dtype == ref.dtype
            assert float(jnp.max(jnp.abs(out - ref))) < 1e-5

        # Static-flag fast path: skips the extra HBM read for the global max.
        out_fast = normalize(x_pixels, mean, std, assume_pixels=True)
        jax.block_until_ready(out_fast)
        ref_fast = _reference(x_pixels, mean, std)
        assert float(jnp.max(jnp.abs(out_fast - ref_fast))) < 1e-5

    print("KERNEL_OK")
</pallas_src>

<mosaic_0001>
module attributes {stable_mosaic.version = 11 : i64} {
  func.func @_normalize_kernel(%arg0: i32, %arg1: i32, %arg2: memref<6x128xf32, #tpu.memory_space<vmem>>, %arg3: memref<6x1xf32, #tpu.memory_space<vmem>>, %arg4: memref<6x1xf32, #tpu.memory_space<vmem>>, %arg5: memref<6x128xf32, #tpu.memory_space<vmem>>) attributes {dimension_semantics = [#tpu.dimension_semantics<parallel>, #tpu.dimension_semantics<parallel>], iteration_bounds = array<i64: 1, 2>, scalar_prefetch = 0 : i64, scratch_operands = 0 : i64, tpu.core_type = #tpu.core_type<tc>, window_params = [{transform_indices = @transform_0, window_bounds = array<i64: 6, 128>}, {pipeline_mode = #tpu.pipeline_mode<synchronous>, transform_indices = @transform_1, window_bounds = array<i64: 6, 1>}, {pipeline_mode = #tpu.pipeline_mode<synchronous>, transform_indices = @transform_2, window_bounds = array<i64: 6, 1>}, {transform_indices = @transform_3, window_bounds = array<i64: 6, 128>}]} {
    %c0 = arith.constant 0 : index
    %c0_0 = arith.constant 0 : index
    %0 = vector.load %arg3[%c0, %c0_0] : memref<6x1xf32, #tpu.memory_space<vmem>>, vector<6x1xf32>
    %c0_1 = arith.constant 0 : index
    %c0_2 = arith.constant 0 : index
    %1 = vector.load %arg4[%c0_1, %c0_2] : memref<6x1xf32, #tpu.memory_space<vmem>>, vector<6x1xf32>
    %c0_3 = arith.constant 0 : index
    %c0_4 = arith.constant 0 : index
    %2 = vector.load %arg2[%c0_3, %c0_4] : memref<6x128xf32, #tpu.memory_space<vmem>>, vector<6x128xf32>
    %3 = vector.broadcast %0 : vector<6x1xf32> to vector<6x128xf32>
    %4 = arith.mulf %2, %3 : vector<6x128xf32>
    %5 = vector.broadcast %1 : vector<6x1xf32> to vector<6x128xf32>
    %6 = arith.addf %4, %5 : vector<6x128xf32>
    %c0_5 = arith.constant 0 : index
    %c0_6 = arith.constant 0 : index
    %7 = vector.load %arg5[%c0_5, %c0_6] : memref<6x128xf32, #tpu.memory_space<vmem>>, vector<6x128xf32>
    tpu.vector_store %arg5[%c0_5, %c0_6], %6 {strides = array<i32>} : memref<6x128xf32, #tpu.memory_space<vmem>>, vector<6x128xf32>,
    return
  }
  func.func @transform_0(%arg0: i32, %arg1: i32) -> (i32, i32) {
    %c0_i32 = arith.constant 0 : i32
    return %arg0, %arg1 : i32, i32
  }
  func.func @transform_1(%arg0: i32, %arg1: i32) -> (i32, i32) {
    %c0_i32 = arith.constant 0 : i32
    %c0_i32_0 = arith.constant 0 : i32
    %c0_i32_1 = arith.constant 0 : i32
    return %c0_i32, %c0_i32_0 : i32, i32
  }
  func.func @transform_2(%arg0: i32, %arg1: i32) -> (i32, i32) {
    %c0_i32 = arith.constant 0 : i32
    %c0_i32_0 = arith.constant 0 : i32
    %c0_i32_1 = arith.constant 0 : i32
    return %c0_i32, %c0_i32_0 : i32, i32
  }
  func.func @transform_3(%arg0: i32, %arg1: i32) -> (i32, i32) {
    %c0_i32 = arith.constant 0 : i32
    return %arg0, %arg1 : i32, i32
  }
}

</mosaic_0001>

<bundles_post_ra>
// kernel: _normalize_impl.1
= control target key start
LH: loop header
LB: loop body
LE: loop exit
PB: predicated region body
PF: predicated region fallthrough
CT: control target
= control target key end

     0   :  { %s381_s12 = smov 0   ;;  %s383_s13 = smov 0   ;;  %s413_s0 = inlined_call_operand.vmem [shape: f32[6,256], index: 0, kind: input, shape index: {}]   ;;  %s414_s1 = inlined_call_operand.vmem [shape: f32[6,1], index: 1, kind: input, shape index: {}]   ;;  %s415_s2 = inlined_call_operand.vmem [shape: f32[6,1], index: 2, kind: input, shape index: {}]   ;;  %s416_s3 = inlined_call_operand.vmem [shape: f32[6,256], index: 3, kind: output, shape index: {}]  }
   0x1   :  { %s385_s14 = smov 0  }
   0x2 LB: > { %s22_s15 = sadd.s32 1, %s354_s13  ;;  %p305_p0 = scmp.ge.s32.totalorder %s358_s14, 1  ;;  %s358_s14 = sphi %s385_s14, %s13_s14   ;;  %s354_s13 = sphi %s383_s13, %s418_s13   ;;  %s350_s12 = sphi %s381_s12, %s417_s12  }
   0x3   : > { %p23_p1 = scmp.ge.s32.totalorder %s22_s15, 2  ;;  %p156_p2 = scmp.lt.s32.totalorder %s358_s14, 3 }
   0x5   : > { %s420_s15 = smov (%p23_p1, %s22_s15), 0  ;;  %p157_p3 = pnand %p305_p0, %p156_p2 }
   0x6   : > { %v202_v0 = vld [vmem:[%s414_s1] sm:$0x3f] (!%p157_p3)  ;;  %v360_v1 = vmov (!%p157_p3), 0   ;;  %p188_p4 = scmp.lt.s32.totalorder (!%p157_p3), %s350_s12, 1 }
   0x7   : > { %160 = sbr.rel (%p157_p3) target bundleno = 143 (0x8f), region = 32  ;;  %335 = vset.pattern.permute.xlu0 (!%p157_p3), %v360_v1  ;;  %v203_v2 = vld [vmem:[%s415_s2] sm:$0x3f] (!%p157_p3) }
   0x8   : > { %207 = vperm.xlu0 (!%p157_p3), %335, %v202_v0  }
   0xc   : > { %213 = vperm.xlu0 (!%p157_p3), %335, %v203_v2  }
   0xe   : > { %s422_s12 = smov (!%p188_p4, %s350_s12), 1 }
   0xf   : > { %s306_s20 = sshll.u32 %s422_s12, 3 }
  0x10   : > { %s193_s23 = scalar_lea.vmem %s413_s0, %s306_s20  ;;  %s201_s26 = scalar_lea.vmem %s416_s3, %s306_s20 }
  0x11   : > { %v204_v4 = vld [vmem:[%s193_s23] sm:$0x3f] }
  0x87   : > { %v208_v3 = vpop.permute.xlu0 %207 }
  0x88   : > { %v210_v5 = vmul.f32 %v208_v3, %v204_v4 }
  0x8b   : > { %v214_v6 = vpop.permute.xlu0 %213 }
  0x8c   : > { %v216_v7 = vadd.f32 %v214_v6, %v210_v5 }
  0x8e   : > { %217 = vst [vmem:[%s201_s26] sm:$0x3f] %v216_v7 }
  0x8f PF: > { %s13_s14 = sadd.s32 1, %s358_s14   ;;  %s417_s12 = smov %s354_s13 }
  0x90   : > { %p10_p5 = scmp.ge.s32.totalorder %s13_s14, 4   ;;  %s418_s13 = smov %s420_s15 }
  0x92   :  { %12 = sbr.rel (!%p10_p5) target bundleno = 2 (0x2), region = 62 }

</bundles_post_ra>
